<compile_context>
chip_gen: v6e
topology: v6e:2x2x1
jax: 0.10.0
libtpu: 0.0.40
codegen_flags: <defaults>
</compile_context>

<pallas_src>
import functools
import math

import jax
import jax.numpy as jnp
from jax import lax
from jax.experimental import pallas as pl
from jax.experimental.pallas import tpu as pltpu

_INV_SQRT2 = 1.0 / math.sqrt(2.0)
_DEFAULT_VMEM_BUDGET = 44 * 1024 * 1024   # conservative: fits v7x's 64 MiB VMEM


def _gelu(h, approximate):
    if approximate:
        # tanh approximation -> EUP (its own bundle slot; effectively free on v6e/v7x)
        return jax.nn.gelu(h, approximate=True)
    # Exact GELU, matches torch.nn.GELU() default: 0.5*x*(1 + erf(x/sqrt(2)))
    return 0.5 * h * (1.0 + lax.erf(h * _INV_SQRT2))


# ---------------------------------------------------------------------------
# Kernels
# ---------------------------------------------------------------------------
def _ffn_resident_kernel(x_ref, w1_ref, b1_ref, w2_ref, b2_ref, o_ref, *, approx_gelu):
    # Weights are fully resident in VMEM (constant index_maps): one grid axis over rows.
    # x_ref: (TR, D)  w1_ref: (D, H)  b1_ref: (1, H) f32  w2_ref: (H, D)  b2_ref: (1, D) f32
    h = jnp.dot(x_ref[...], w1_ref[...], preferred_element_type=jnp.float32) + b1_ref[...]
    h = _gelu(h, approx_gelu)
    # TODO(synk): Dropout(p>0) in training mode is not implemented (p=0 / inference == identity).
    y = jnp.dot(h.astype(w2_ref.dtype), w2_ref[...], preferred_element_type=jnp.float32)
    o_ref[...] = (y + b2_ref[...]).astype(o_ref.dtype)


def _ffn_htiled_kernel(x_ref, w1_ref, b1_ref, w2_ref, b2_ref, o_ref, acc_ref, *, approx_gelu):
    # Fallback: H is a reduction grid axis ("arbitrary", innermost); weight H-slabs are
    # streamed and accumulated into a (TR, D) f32 VMEM scratch.
    k = pl.program_id(1)

    @pl.when(k == 0)
    def _init():
        acc_ref[...] = jnp.zeros_like(acc_ref)

    h = jnp.dot(x_ref[...], w1_ref[...], preferred_element_type=jnp.float32) + b1_ref[...]
    h = _gelu(h, approx_gelu)
    acc_ref[...] += jnp.dot(
        h.astype(w2_ref.dtype), w2_ref[...], preferred_element_type=jnp.float32
    )

    @pl.when(k == pl.num_programs(1) - 1)
    def _finalize():
        o_ref[...] = (acc_ref[...] + b2_ref[...]).astype(o_ref.dtype)


# ---------------------------------------------------------------------------
# Planning helpers (VMEM budgeting / tile selection)
# ---------------------------------------------------------------------------
def _resident_vmem_bytes(tr, D, H, cdt_size, out_size):
    return (2 * tr * D * cdt_size                 # x tile (double buffered)
            + 2 * tr * D * out_size               # out tile (double buffered)
            + 2 * D * H * cdt_size                # w1 (budget 2 buffers conservatively)
            + 2 * H * D * cdt_size                # w2
            + 2 * (H + D) * 4                     # biases (f32)
            + tr * H * 4 + tr * H * cdt_size)     # hidden intermediate (f32 + bf16 cast)


def _htiled_vmem_bytes(tr, th, D, H, cdt_size, out_size):
    return (2 * tr * D * cdt_size                 # x tile
            + 2 * tr * D * out_size               # out tile
            + 2 * D * th * cdt_size               # w1 H-slab (double buffered)
            + 2 * th * D * cdt_size               # w2 H-slab
            + 2 * (th + D) * 4                    # biases
            + tr * D * 4                          # f32 accumulator scratch
            + tr * th * 4 + tr * th * cdt_size)   # hidden slab intermediate


def _prefer_two_tiles(trs_desc, rows_p):
    # Prefer the largest row tile that still gives >= 2 grid steps so the
    # "parallel" row axis can split across v7x's two TensorCores.
    for tr in trs_desc:
        if rows_p // tr >= 2:
            return tr
    return trs_desc[0]


def _plan(rows_p, D, H, cdt_size, out_size, budget):
    min_tr = 8 if cdt_size >= 4 else 16          # bf16: keep vregs dense (2 rows/sublane)
    trs = [c for c in (1024, 512, 256, 128, 64, 32, 16, 8)
           if min_tr <= c <= rows_p and rows_p % c == 0]
    if not trs:
        trs = [rows_p]

    # Preferred plan: weights fully resident in VMEM (DMA'd once).
    resident_fit = [tr for tr in trs
                    if _resident_vmem_bytes(tr, D, H, cdt_size, out_size) <= budget]
    if resident_fit:
        tr = _prefer_two_tiles(resident_fit, rows_p)
        return "resident", tr, None, _resident_vmem_bytes(tr, D, H, cdt_size, out_size)

    # Fallback: stream H-slabs of the weights (reduction grid axis, f32 accumulator).
    ths = [c for c in (512, 256, 128) if c <= H and H % c == 0] or [H]
    fallback = None
    for tr in trs:                               # largest tr first
        for th in ths:                           # largest th first
            est = _htiled_vmem_bytes(tr, th, D, H, cdt_size, out_size)
            if est <= budget:
                return "htiled", tr, th, est
            fallback = ("htiled", tr, th, est)
    return fallback


# ---------------------------------------------------------------------------
# Public entry point
# ---------------------------------------------------------------------------
def feed_forward(x, w1, b1, w2, b2, *, approximate_gelu=False,
                 vmem_budget_bytes=None, vmem_limit_bytes=None):
    """x: [B, S, D]; w1: [D, H]; b1: [H]; w2: [H, D]; b2: [D] -> [B, S, D].

    Compute dtype follows x.dtype (pass bf16 activations for bf16 MXU compute);
    accumulation and biases are always f32.
    """
    B, S, D = x.shape
    H = w1.shape[1]
    rows = B * S

    cdt = x.dtype
    cdt_size = jnp.dtype(cdt).itemsize
    out_size = cdt_size

    # Pad rows so the MXU M dimension is well utilized even for awkward sequence
    # lengths (ViT: S=197 is prime -> B*S otherwise only divides by 8).
    align = 256 if rows >= 256 else 16
    rows_p = ((rows + align - 1) // align) * align

    budget = _DEFAULT_VMEM_BUDGET if vmem_budget_bytes is None else vmem_budget_bytes
    mode, tr, th, est = _plan(rows_p, D, H, cdt_size, out_size, budget)
    n_row = rows_p // tr

    x2 = x.reshape(rows, D)
    if rows_p != rows:
        x2 = jnp.pad(x2, ((0, rows_p - rows), (0, 0)))
    w1c = w1.astype(cdt)
    w2c = w2.astype(cdt)
    b1_2 = b1.reshape(1, H).astype(jnp.float32)
    b2_2 = b2.reshape(1, D).astype(jnp.float32)

    if vmem_limit_bytes is None:
        # Explicit limit: lifts v5e's 16 MiB scoped default, stays under v7x's 64 MiB.
        vmem_limit_bytes = min(max(int(est * 1.5) + (4 << 20), 32 << 20), 56 << 20)

    weight_bytes = 2 * D * H * cdt_size
    weight_traffic = weight_bytes if mode == "resident" else weight_bytes * n_row
    cost = pl.CostEstimate(
        flops=4 * rows_p * D * H,                          # two GEMMs
        transcendentals=rows_p * H,                        # erf/tanh per hidden activation
        bytes_accessed=(rows_p * D * cdt_size              # x in
                        + rows_p * D * out_size            # y out
                        + weight_traffic                   # w1 + w2 (actual re-reads)
                        + 4 * (H + D)),                    # biases (f32)
    )

    if mode == "resident":
        kernel = functools.partial(_ffn_resident_kernel, approx_gelu=approximate_gelu)
        out = pl.pallas_call(
            kernel,
            out_shape=jax.ShapeDtypeStruct((rows_p, D), x.dtype),
            grid_spec=pltpu.PrefetchScalarGridSpec(
                num_scalar_prefetch=0,
                grid=(n_row,),
                in_specs=[
                    pl.BlockSpec((tr, D), lambda i: (i, 0)),   # x row tile
                    pl.BlockSpec((D, H), lambda i: (0, 0)),    # w1 resident
                    pl.BlockSpec((1, H), lambda i: (0, 0)),    # b1 (f32)
                    pl.BlockSpec((H, D), lambda i: (0, 0)),    # w2 resident
                    pl.BlockSpec((1, D), lambda i: (0, 0)),    # b2 (f32)
                ],
                out_specs=pl.BlockSpec((tr, D), lambda i: (i, 0)),
            ),
            compiler_params=pltpu.CompilerParams(
                dimension_semantics=("parallel",),
                vmem_limit_bytes=vmem_limit_bytes,
            ),
            cost_estimate=cost,
        )(x2, w1c, b1_2, w2c, b2_2)
    else:
        n_h = H // th
        kernel = functools.partial(_ffn_htiled_kernel, approx_gelu=approximate_gelu)
        out = pl.pallas_call(
            kernel,
            out_shape=jax.ShapeDtypeStruct((rows_p, D), x.dtype),
            grid_spec=pltpu.PrefetchScalarGridSpec(
                num_scalar_prefetch=0,
                grid=(n_row, n_h),                            # H (reduction) innermost
                in_specs=[
                    pl.BlockSpec((tr, D), lambda i, k: (i, 0)),   # x row tile
                    pl.BlockSpec((D, th), lambda i, k: (0, k)),   # w1 H-slab
                    pl.BlockSpec((1, th), lambda i, k: (0, k)),   # b1 H-slab (f32)
                    pl.BlockSpec((th, D), lambda i, k: (k, 0)),   # w2 H-slab
                    pl.BlockSpec((1, D), lambda i, k: (0, 0)),    # b2 (f32)
                ],
                out_specs=pl.BlockSpec((tr, D), lambda i, k: (i, 0)),
                scratch_shapes=[pltpu.VMEM((tr, D), jnp.float32)],
            ),
            compiler_params=pltpu.CompilerParams(
                dimension_semantics=("parallel", "arbitrary"),
                vmem_limit_bytes=vmem_limit_bytes,
            ),
            cost_estimate=cost,
        )(x2, w1c, b1_2, w2c, b2_2)

    if rows_p != rows:
        out = out[:rows]
    return out.reshape(B, S, D)


def _reference(x, w1, b1, w2, b2):
    h = x @ w1 + b1
    h = 0.5 * h * (1.0 + lax.erf(h * _INV_SQRT2))
    return h @ w2 + b2


if __name__ == "__main__":
    # Small shapes consistent with the module: batch=2, seq=8, dim=32, hidden=64.
    B, S, D, Hdim = 2, 8, 32, 64
    key = jax.random.PRNGKey(0)
    kx, k1, k2, k3, k4 = jax.random.split(key, 5)

    x = jax.random.normal(kx, (B, S, D), dtype=jnp.float32)
    # nn.Linear(dim, hidden) / nn.Linear(hidden, dim) stored as [in, out]
    # (transposed vs. PyTorch's [out, in]).
    w1 = jax.random.normal(k1, (D, Hdim), dtype=jnp.float32) * (1.0 / math.sqrt(D))
    b1 = jax.random.normal(k2, (Hdim,), dtype=jnp.float32) * 0.01
    w2 = jax.random.normal(k3, (Hdim, D), dtype=jnp.float32) * (1.0 / math.sqrt(Hdim))
    b2 = jax.random.normal(k4, (D,), dtype=jnp.float32) * 0.01

    y_ref = _reference(x, w1, b1, w2, b2)

    # f32 path: matches the pure-JAX reference closely.
    y = jax.block_until_ready(feed_forward(x, w1, b1, w2, b2))
    assert y.shape == (B, S, D)
    assert jnp.allclose(y, y_ref, atol=1e-5, rtol=1e-5), "f32 mismatch vs reference"

    # bf16 fast path (MXU-native, f32 accumulate): looser tolerance for bf16 rounding.
    yb = jax.block_until_ready(feed_forward(x.astype(jnp.bfloat16), w1, b1, w2, b2))
    assert yb.dtype == jnp.bfloat16
    assert jnp.allclose(yb.astype(jnp.float32), y_ref, atol=7.5e-2, rtol=5e-2), \
        "bf16 mismatch vs reference"

    print("KERNEL_OK")
</pallas_src>

<mosaic_0001>
module attributes {stable_mosaic.version = 11 : i64} {
  func.func @_ffn_resident_kernel(%arg0: i32, %arg1: memref<8x32xf32, #tpu.memory_space<vmem>>, %arg2: memref<32x64xf32, #tpu.memory_space<vmem>>, %arg3: memref<1x64xf32, #tpu.memory_space<vmem>>, %arg4: memref<64x32xf32, #tpu.memory_space<vmem>>, %arg5: memref<1x32xf32, #tpu.memory_space<vmem>>, %arg6: memref<8x32xf32, #tpu.memory_space<vmem>>) attributes {dimension_semantics = [#tpu.dimension_semantics<parallel>], iteration_bounds = array<i64: 2>, scalar_prefetch = 0 : i64, scratch_operands = 0 : i64, tpu.core_type = #tpu.core_type<tc>, window_params = [{transform_indices = @transform_0, window_bounds = array<i64: 8, 32>}, {pipeline_mode = #tpu.pipeline_mode<synchronous>, transform_indices = @transform_1, window_bounds = array<i64: 32, 64>}, {pipeline_mode = #tpu.pipeline_mode<synchronous>, transform_indices = @transform_2, window_bounds = array<i64: 1, 64>}, {pipeline_mode = #tpu.pipeline_mode<synchronous>, transform_indices = @transform_3, window_bounds = array<i64: 64, 32>}, {pipeline_mode = #tpu.pipeline_mode<synchronous>, transform_indices = @transform_4, window_bounds = array<i64: 1, 32>}, {transform_indices = @transform_5, window_bounds = array<i64: 8, 32>}]} {
    %c0 = arith.constant 0 : index
    %c0_0 = arith.constant 0 : index
    %0 = vector.load %arg1[%c0, %c0_0] : memref<8x32xf32, #tpu.memory_space<vmem>>, vector<8x32xf32>
    %c0_1 = arith.constant 0 : index
    %c0_2 = arith.constant 0 : index
    %1 = vector.load %arg2[%c0_1, %c0_2] : memref<32x64xf32, #tpu.memory_space<vmem>>, vector<32x64xf32>
    %cst = arith.constant dense<0.000000e+00> : vector<8x64xf32>
    %2 = tpu.matmul %0, %1, %cst {dimension_numbers = #tpu.dot_dimension_numbers<[1], [0], [0], [1], [0, 0, 1, 1], [], []>} : vector<8x32xf32>, vector<32x64xf32>, vector<8x64xf32> -> vector<8x64xf32>
    %c0_3 = arith.constant 0 : index
    %c0_4 = arith.constant 0 : index
    %3 = vector.load %arg3[%c0_3, %c0_4] : memref<1x64xf32, #tpu.memory_space<vmem>>, vector<1x64xf32>
    %4 = vector.broadcast %3 : vector<1x64xf32> to vector<8x64xf32>
    %5 = arith.addf %2, %4 : vector<8x64xf32>
    %cst_5 = arith.constant 5.000000e-01 : f32
    %6 = vector.broadcast %cst_5 : f32 to vector<8x64xf32>
    %7 = arith.mulf %6, %5 : vector<8x64xf32>
    %cst_6 = arith.constant 0.707106769 : f32
    %8 = vector.broadcast %cst_6 : f32 to vector<8x64xf32>
    %9 = arith.mulf %5, %8 : vector<8x64xf32>
    %10 = math.erf %9 : vector<8x64xf32>
    %cst_7 = arith.constant 1.000000e+00 : f32
    %11 = vector.broadcast %cst_7 : f32 to vector<8x64xf32>
    %12 = arith.addf %11, %10 : vector<8x64xf32>
    %13 = arith.mulf %7, %12 : vector<8x64xf32>
    %c0_8 = arith.constant 0 : index
    %c0_9 = arith.constant 0 : index
    %14 = vector.load %arg4[%c0_8, %c0_9] : memref<64x32xf32, #tpu.memory_space<vmem>>, vector<64x32xf32>
    %cst_10 = arith.constant dense<0.000000e+00> : vector<8x32xf32>
    %15 = tpu.matmul %13, %14, %cst_10 {dimension_numbers = #tpu.dot_dimension_numbers<[1], [0], [0], [1], [0, 0, 1, 1], [], []>} : vector<8x64xf32>, vector<64x32xf32>, vector<8x32xf32> -> vector<8x32xf32>
    %c0_11 = arith.constant 0 : index
    %c0_12 = arith.constant 0 : index
    %16 = vector.load %arg5[%c0_11, %c0_12] : memref<1x32xf32, #tpu.memory_space<vmem>>, vector<1x32xf32>
    %17 = vector.broadcast %16 : vector<1x32xf32> to vector<8x32xf32>
    %18 = arith.addf %15, %17 : vector<8x32xf32>
    %c0_13 = arith.constant 0 : index
    %c0_14 = arith.constant 0 : index
    %19 = vector.load %arg6[%c0_13, %c0_14] : memref<8x32xf32, #tpu.memory_space<vmem>>, vector<8x32xf32>
    tpu.vector_store %arg6[%c0_13, %c0_14], %18 {strides = array<i32>} : memref<8x32xf32, #tpu.memory_space<vmem>>, vector<8x32xf32>,
    return
  }
  func.func @transform_0(%arg0: i32) -> (i32, i32) {
    %c0_i32 = arith.constant 0 : i32
    %c0_i32_0 = arith.constant 0 : i32
    return %arg0, %c0_i32 : i32, i32
  }
  func.func @transform_1(%arg0: i32) -> (i32, i32) {
    %c0_i32 = arith.constant 0 : i32
    %c0_i32_0 = arith.constant 0 : i32
    %c0_i32_1 = arith.constant 0 : i32
    return %c0_i32, %c0_i32_0 : i32, i32
  }
  func.func @transform_2(%arg0: i32) -> (i32, i32) {
    %c0_i32 = arith.constant 0 : i32
    %c0_i32_0 = arith.constant 0 : i32
    %c0_i32_1 = arith.constant 0 : i32
    return %c0_i32, %c0_i32_0 : i32, i32
  }
  func.func @transform_3(%arg0: i32) -> (i32, i32) {
    %c0_i32 = arith.constant 0 : i32
    %c0_i32_0 = arith.constant 0 : i32
    %c0_i32_1 = arith.constant 0 : i32
    return %c0_i32, %c0_i32_0 : i32, i32
  }
  func.func @transform_4(%arg0: i32) -> (i32, i32) {
    %c0_i32 = arith.constant 0 : i32
    %c0_i32_0 = arith.constant 0 : i32
    %c0_i32_1 = arith.constant 0 : i32
    return %c0_i32, %c0_i32_0 : i32, i32
  }
  func.func @transform_5(%arg0: i32) -> (i32, i32) {
    %c0_i32 = arith.constant 0 : i32
    %c0_i32_0 = arith.constant 0 : i32
    return %arg0, %c0_i32 : i32, i32
  }
}

</mosaic_0001>

<bundles_post_ra>
// kernel: tpu_custom_call.1
= control target key start
LH: loop header
LB: loop body
LE: loop exit
PB: predicated region body
PF: predicated region fallthrough
CT: control target
= control target key end

     0   :  { %10 = vsyncpa [#allocation3], 0  ;;  %s807_s0 = inlined_call_operand.vmem [shape: f32[16,32], index: 0, kind: input, shape index: {}]   ;;  %s808_s1 = inlined_call_operand.vmem [shape: f32[32,64], index: 1, kind: input, shape index: {}]   ;;  %s809_s2 = inlined_call_operand.vmem [shape: f32[1,64], index: 2, kind: input, shape index: {}]   ;;  %s810_s3 = inlined_call_operand.vmem [shape: f32[64,32], index: 3, kind: input, shape index: {}]   ;;  %s811_s4 = inlined_call_operand.vmem [shape: f32[1,32], index: 4, kind: input, shape index: {}]   ;;  %s812_s5 = inlined_call_operand.hbm [shape: f32[16,32], index: 5, kind: output, shape index: {}]  }
   0x1   :  { %12 = vsyncpa [#allocation3 + $0x1], 0  ;;  %s670_s18 = smov 0   ;;  %s672_s19 = smov 0  }
   0x2   :  { %s674_s20 = smov 0   ;;  %s676_s21 = smov 0  }
   0x3 LB: > { %s691_s22 = sadd.s32 4294967295, %s635_s21   ;;  %s474_s23 = sadd.s32 4294967294, %s635_s21   ;;  %s635_s21 = sphi %s676_s21, %s818_s21   ;;  %s631_s20 = sphi %s674_s20, %s817_s20   ;;  %s627_s19 = sphi %s672_s19, %s816_s19   ;;  %s623_s18 = sphi %s670_s18, %s815_s18  }
   0x4   : > { %s695_s24 = sadd.s32 1, %s635_s21   ;;  %s135_s25 = sadd.s32 1, %s631_s20 }
   0x5   : > { %s132_s26 = ssub.s32 %s635_s21, %s695_s24  ;;  %p145_p0 = scmp.ne.s32.totalorder %s631_s20, %s627_s19 }
   0x6   : > { %p133_p1 = scmp.eq.s32.totalorder %s132_s26, 0  ;;  %p146_p2 = scmp.eq.s32.totalorder %s691_s22, 1 }
   0x7   : > { %p151_p3 = scmp.ne.s32.totalorder %s627_s19, %s623_s18  ;;  %p152_p4 = scmp.eq.s32.totalorder %s474_s23, 1 }
   0x8   : > { %s706_s27 = scalar_select %p133_p1, %s631_s20, %s135_s25  }
   0x9   : > { %p708_p5 = por %p146_p2, %p145_p0  ;;  %p712_p6 = por %p152_p4, %p151_p3 }
   0xa   : > { %p477_p7 = scmp.ge.s32.totalorder %s635_s21, 1  ;;  %p189_p8 = scmp.lt.s32.totalorder %s635_s21, 3 }
   0xc   : > { %p190_p9 = pnand %p477_p7, %p189_p8 }
   0xd   : > { %p216_p10 = scmp.lt.s32.totalorder (!%p190_p9), %s691_s22, 1  ;;  %s213_s26 = sand.u32 (!%p190_p9), 1, %s627_s19  }
   0xe   : > { %193 = sbr.rel (%p190_p9) target bundleno = 451 (0x1c3), region = 40  ;;  %s478_s30 = sshll.u32 (!%p190_p9), %s213_s26, 3 }
   0xf   : > { %s485_s8 = sshll.u32 (!%p190_p9), %s691_s22, 7  ;;  %s402_s14 = scalar_lea.sflag (!%p190_p9), [#allocation3], %s213_s26 }
  0x10   : > { %s771_s13 = scalar_lea.hbm (!%p190_p9), %s812_s5, %s485_s8 }
  0x13   : > { %v224_v0 = vld [vmem:[%s808_s1 + $0x18] sm:$0xff]  ;;  %v637_v1 = vmov 0.0   ;;  %v223_v2 = vld [vmem:[%s808_s1 + $0x10] sm:$0xff]  ;;  %vm638_vm0 = vmmov 0   ;;  %s217_s9 = scalar_select %p216_p10, %s691_s22, 1  ;;  %v222_v3 = vld [vmem:[%s808_s1 + $0x8] sm:$0xff] }
  0x14   : > { %502 = vmatprep.subr.mxu0 %v637_v1  ;;  %510 = vmatprep.mubr.msk.f32.mxu0 %vm638_vm0, %v637_v1  ;;  %v221_v4 = vld [vmem:[%s808_s1] sm:$0xff]  ;;  %vm232_vm1 = vcmask 261120   ;;  %v318_v6 = vld [vmem:[%s810_s3 + $0x38] sm:$0xff]  ;;  %v317_v7 = vld [vmem:[%s810_s3 + $0x30] sm:$0xff]  ;;  %vm326_vm2 = vcmask 523264   ;;  %s639_s22 = smov [#allocation2]  }
  0x15   : > { %503 = vmatpush3.msra.mxu0 %v224_v0  ;;  %513 = vmatprep.subr.mxu1 %v637_v1  ;;  %s479_s12 = sshll.u32 %s217_s9, 3  ;;  %v316_v8 = vld [vmem:[%s810_s3 + $0x28] sm:$0xff]  ;;  %v315_v9 = vld [vmem:[%s810_s3 + $0x20] sm:$0xff]  ;;  %v314_v10 = vld [vmem:[%s810_s3 + $0x18] sm:$0xff]  ;;  %s215_s9 = scalar_lea.vmem [#allocation2], %s478_s30 }
  0x16   : > { %504 = vmatprep.subr.mxu0 %v637_v1  ;;  %529 = vmatprep.mubr.msk.f32.mxu1 %vm638_vm0, %v637_v1  ;;  %s219_s17 = scalar_lea.vmem %s807_s0, %s479_s12  ;;  %v313_v11 = vld [vmem:[%s810_s3 + $0x10] sm:$0xff]  ;;  %v312_v12 = vld [vmem:[%s810_s3 + $0x8] sm:$0xff]  ;;  %v311_v13 = vld [vmem:[%s810_s3] sm:$0xff]  ;;  %s415_s10 = sshll.u32 %s215_s9, 4  ;;  %s416_s10 = int_to_ptr.vmem [resolvable:$true] %s415_s10 }
  0x17   : > { %505 = vmatpush3.msra.mxu0 %v223_v2  ;;  %v220_v5 = vld [vmem:[%s219_s17] sm:$0xff]  ;;  %514 = vmatpush3.msra.mxu1 %v318_v6  ;;  %s575_s15 = scalar_lea.vmem %s416_s10, 128  ;;  %s579_s16 = sshll.u32 %s639_s22, 4  ;;  %s580_s16 = int_to_ptr.vmem [resolvable:$false] %s579_s16 }
  0x18   : > { %506 = vmatprep.subr.mxu0 %v637_v1  ;;  %515 = vmatprep.subr.mxu1 %v637_v1  ;;  %v480_v14 = vld [vmem:[%s809_s2] ss:$0 sm:$0xff]  ;;  %p576_p11 = scmp.ne.s32.totalorder %s416_s10, %s575_s15  ;;  %s581_s17 = scalar_lea.vmem %s580_s16, 256 }
  0x19   : > { %507 = vmatpush3.msra.mxu0 %v222_v3  ;;  %516 = vmatpush3.msra.mxu1 %v317_v7  ;;  %v482_v23 = vld [vmem:[%s811_s4] ss:$0 sm:$0xff]  ;;  %p582_p0 = scmp.lt.s32.totalorder %s416_s10, %s580_s16  ;;  %p583_p1 = scmp.lt.s32.totalorder %s581_s17, %s575_s15 }
  0x1a   : > { %508 = vmatprep.subr.mxu0 %v637_v1  ;;  %517 = vmatprep.subr.mxu1 %v637_v1  ;;  %p577_p12 = pnand %p576_p11, %p708_p5 }
  0x1b   : > { %509 = vmatpush3.msra.mxu0 %v221_v4  ;;  %518 = vmatpush3.msra.mxu1 %v316_v8  ;;  %p584_p2 = por %p583_p1, %p582_p0 }
  0x1c   : > { %511 = vmatmul.mubr.msk.f32.vlgmr.msra.gmra.mxu0 %vm232_vm1, %v220_v5  ;;  %519 = vmatprep.subr.mxu1 %v637_v1  ;;  %p578_p13 = pneg %p577_p12 }
  0x1d   : > { %520 = vmatpush3.msra.mxu1 %v315_v9 }
  0x1e   : > { %521 = vmatprep.subr.mxu1 %v637_v1  ;;  %p585_p3 = pnand %p584_p2, %p578_p13 }
  0x1f   : > { %522 = vmatpush3.msra.mxu1 %v314_v10 }
  0x20   : > { %523 = vmatprep.subr.mxu1 %v637_v1 }
  0x21   : > { %524 = vmatpush3.msra.mxu1 %v313_v11 }
  0x22   : > { %525 = vmatprep.subr.mxu1 %v637_v1 }
  0x23   : > { %526 = vmatpush3.msra.mxu1 %v312_v12 }
  0x24   : > { %527 = vmatprep.subr.mxu1 %v637_v1 }
  0x25   : > { %528 = vmatpush3.msra.mxu1 %v311_v13 }
  0xdc   : > { %v302_v15 = vpop.f32.mrf.mxu0 }
  0xdd   : > { %v303_v16 = vadd.f32 %v480_v14, %v302_v15 }
  0xde   : > { %v512_v17 = vpop.f32.mrf.mxu0 }
  0xdf   : > { %v307_v18 = vmul.f32 0.70710677, %v303_v16  ;;  %v306_v20 = vmul.f32 0.5, %v303_v16 }
  0xe1   : > { %573 = verf.f32 %v307_v18 }
  0xee   : > { %v574_v19 = vpop.eup %573 }
  0xef   : > { %v309_v21 = vadd.f32 1.0, %v574_v19 }
  0xf1   : > { %v310_v22 = vmul.f32 %v309_v21, %v306_v20 }
  0xf3   : > { %530 = vmatmul.mubr.msk.f32.vlgmr.msra.gmra.mxu1 %vm326_vm2, %v310_v22 }
 0x1b3   : > { %v396_v24 = vpop.f32.mrf.mxu1 }
 0x1b4   : > { %v397_v25 = vadd.f32 %v482_v23, %v396_v24 }
 0x1b5   : > { %v531_v26 = vpop.f32.mrf.mxu1 }
 0x1b6   : > { %400 = vst.msk [vmem:[%s215_s9] sm:$0xff] %vm232_vm1, %v397_v25 }
 0x1b7   : > { %588 = shalt.err (!%p585_p3)
}
 0x1b8   : > { %s589_s23 = scalar_lea.hbm %s771_s13, 128  ;;  %s593_s30 = scalar_lea.hbm %s812_s5, 256 }
 0x1b9   : > { %p590_p4 = scmp.ne.s32.totalorder %s771_s13, %s589_s23  ;;  %p594_p9 = scmp.lt.s32.totalorder %s771_s13, %s812_s5 }
 0x1ba   : > { %p595_p10 = scmp.lt.s32.totalorder %s593_s30, %s589_s23 }
 0x1bb   : > { %p591_p7 = pnand %p590_p4, %p708_p5 }
 0x1bc   : > { %p596_p11 = por %p595_p10, %p594_p9 }
 0x1bd   : > { %p592_p8 = pneg %p591_p7 }
 0x1bf   : > { %p597_p12 = pnand %p596_p11, %p592_p8 }
 0x1c1   : > { %600 = shalt.err (!%p597_p12)
}
 0x1c2   : > { %532 = dma.vmem_to_hbm [thread:$0]  (%p708_p5), %s416_s10, 128, %s771_s13, %s402_s14  }
 0x1c3 PF: > { %p538_p13 = scmp.ge.s32.totalorder %s635_s21, 2  ;;  %s427_s8 = sand.u32 1, %s623_s18  }
 0x1c4   : > { %s428_s9 = scalar_lea.sflag [#allocation3], %s427_s8 }
 0x1c5   : > { %p535_p0 = pnand %p538_p13, %p712_p6 }
 0x1c7   : > { %p536_p1 = pneg %p535_p0 }
 0x1c9   : > { %618 = dma.done.wait (%p536_p1), %s428_s9, 128  }
 0x1ca   : > { %620 = vsyncadd (%p536_p1), %s428_s9, 4294967168  ;;  %p15_p2 = scmp.ge.s32.totalorder %s695_s24, 4   ;;  %s815_s18 = smov %s627_s19 }
 0x1cb   : > { %s816_s19 = smov %s631_s20  ;;  %s817_s20 = smov %s706_s27 }
 0x1cc   : > { %s818_s21 = smov %s695_s24  ;;  %17 = sbr.rel (!%p15_p2) target bundleno = 3 (0x3), region = 75 }
 0x1d1   :  { %433 = vsyncpa [#allocation3], 1 }
 0x1d2   :  { %435 = vsyncpa [#allocation3 + $0x1], 1 }

</bundles_post_ra>
